<compile_context>
chip_gen: v7x
topology: tpu7x:2x2x1
jax: 0.10.0
libtpu: 0.0.40
codegen_flags: <defaults>
</compile_context>

<pallas_src>
import functools

import jax
import jax.numpy as jnp
from jax import lax
from jax.experimental import pallas as pl
from jax.experimental.pallas import tpu as pltpu

LANES = 128
SUBLANES = 8


def _silog_partial_kernel(pred_ref, target_ref, out_ref, *, eps, n_rows, rpb, bpc):
    """Accumulates per-chunk [sum(d), sum(d^2)] into (8,128) f32 slabs."""
    c = pl.program_id(0)   # chunk (parallel; one per TensorCore on v7x)
    i = pl.program_id(1)   # row-block within the chunk (arbitrary / reduction)

    @pl.when(i == 0)
    def _():
        out_ref[...] = jnp.zeros_like(out_ref)

    # Elementwise hot path on the (rpb, 128) tile; cast in-kernel so bf16
    # inputs stream at half the HBM bytes.
    p = pred_ref[...].astype(jnp.float32)
    t = target_ref[...].astype(jnp.float32)
    # Fused log: one EUP transcendental per element instead of two.
    d = jnp.log((t + eps) / (p + eps))

    # Mask the ragged tail: rows past n_rows are either Pallas partial-block
    # padding (garbage) or belong to a fully out-of-range block of an uneven
    # chunk split (whose DMA was clamped to a valid block).  Select, not
    # multiply, so NaN/Inf from garbage cannot propagate.
    row0 = (c * bpc + i) * rpb
    local_row = lax.broadcasted_iota(jnp.int32, (d.shape[0], LANES), 0)
    d = jnp.where(row0 + local_row < n_rows, d, 0.0)

    if rpb % SUBLANES == 0:
        # Fold into the (8,128) accumulators with pure VPU adds
        # ((rows,128)->(rows/8,8,128) is layout-preserving).
        d3 = d.reshape(rpb // SUBLANES, SUBLANES, LANES)
        out_ref[0, 0, :, :] += jnp.sum(d3, axis=0)
        out_ref[0, 1, :, :] += jnp.sum(d3 * d3, axis=0)
    else:
        # Tiny-input fallback (fewer than 8 aligned rows): single-row store.
        out_ref[0, 0, 0:1, :] += jnp.sum(d, axis=0, keepdims=True)
        out_ref[0, 1, 0:1, :] += jnp.sum(d * d, axis=0, keepdims=True)


def silog_loss(pred, target, lambd=0.5, eps=1e-6, block_bytes=2 << 20,
               num_chunks=2):
    """Scale-invariant log loss, scalar float32 output."""
    n_elems = pred.size
    assert target.size == n_elems, "pred/target must have the same number of elements"

    # Flatten to a lane-dense layout; keep original dtypes (cast in-kernel).
    p_flat = pred.reshape(-1)
    t_flat = target.reshape(-1)

    rows = pl.cdiv(n_elems, LANES)
    pad = rows * LANES - n_elems
    if pad:
        # TODO(synk): the sub-128 remainder still costs one full-copy pad; all
        # sizes that are multiples of 128 stream with zero host-side copies.
        # Padding with 1.0 is exactly neutral (d = log(1) = 0).
        p_flat = jnp.concatenate([p_flat, jnp.ones((pad,), p_flat.dtype)])
        t_flat = jnp.concatenate([t_flat, jnp.ones((pad,), t_flat.dtype)])

    p2 = p_flat.reshape(rows, LANES)
    t2 = t_flat.reshape(rows, LANES)

    # Rows per block: dtype-aware so each input block is ~block_bytes
    # (f32 -> 4096 rows = 2 MiB, bf16 -> 8192 rows).  Multiple of 32 so the
    # block shape is legal for every dtype tiling; for small inputs use the
    # full row extent (always a legal block shape).
    max_itemsize = max(p2.dtype.itemsize, t2.dtype.itemsize)
    rpb_target = max(32, (block_bytes // (LANES * max_itemsize) // 32) * 32)
    rpb = int(rows) if rows <= rpb_target else int(rpb_target)

    grid_rows = pl.cdiv(rows, rpb)               # total row-blocks
    num_chunks = max(1, min(int(num_chunks), int(grid_rows)))
    bpc = pl.cdiv(grid_rows, num_chunks)         # row-blocks per chunk
    last_block = int(grid_rows) - 1

    def in_map(c, i):
        # Clamp so the DMA never starts past the array; logically out-of-range
        # blocks (uneven chunk split) are fully masked inside the kernel.
        return (jnp.minimum(c * bpc + i, last_block), 0)

    kernel = functools.partial(
        _silog_partial_kernel, eps=float(eps), n_rows=int(rows),
        rpb=int(rpb), bpc=int(bpc))

    # VMEM budget: 2 inputs x 2 pipeline buffers x block, plus headroom for
    # the f32 elementwise temporaries.  Defaults land at 32 MiB, which fits
    # every generation's scoped VMEM and raises v5e's 16 MiB default.
    in_buf_bytes = 2 * rpb * LANES * (p2.dtype.itemsize + t2.dtype.itemsize)
    vmem_limit = int(max(32 << 20, 3 * in_buf_bytes + (8 << 20)))

    out_partials = pl.pallas_call(
        kernel,
        out_shape=jax.ShapeDtypeStruct((num_chunks, 2, SUBLANES, LANES),
                                       jnp.float32),
        grid_spec=pltpu.PrefetchScalarGridSpec(
            num_scalar_prefetch=0,
            grid=(num_chunks, int(bpc)),
            in_specs=[
                pl.BlockSpec((rpb, LANES), in_map),
                pl.BlockSpec((rpb, LANES), in_map),
            ],
            out_specs=pl.BlockSpec((1, 2, SUBLANES, LANES),
                                   lambda c, i: (c, 0, 0, 0)),
        ),
        compiler_params=pltpu.CompilerParams(
            dimension_semantics=("parallel", "arbitrary"),
            vmem_limit_bytes=vmem_limit,
        ),
    )(p2, t2)

    # Tiny epilogue in plain JAX: combine per-chunk partial sums and finish.
    totals = jnp.sum(out_partials, axis=(0, 2, 3))     # [sum(d), sum(d^2)]
    inv_n = jnp.float32(1.0 / n_elems)
    mean = totals[0] * inv_n
    mean_sq = totals[1] * inv_n
    return jnp.sqrt(mean_sq - jnp.float32(lambd) * mean * mean + jnp.float32(eps))


def silog_loss_ref(pred, target, lambd=0.5, eps=1e-6):
    pred = pred.astype(jnp.float32)
    target = target.astype(jnp.float32)
    d = jnp.log(target + eps) - jnp.log(pred + eps)
    return jnp.sqrt(jnp.mean(d ** 2) - lambd * jnp.mean(d) ** 2 + eps)


if __name__ == "__main__":
    key = jax.random.PRNGKey(0)
    kp, kt, kp2, kt2, kp3, kt3 = jax.random.split(key, 6)

    # NCHW depth-style inputs, strictly positive (depth maps are positive).
    B, C, H, W = 2, 4, 16, 16
    pred = jax.random.uniform(kp, (B, C, H, W), jnp.float32, minval=0.1, maxval=10.0)
    target = jax.random.uniform(kt, (B, C, H, W), jnp.float32, minval=0.1, maxval=10.0)
    loss = jax.block_until_ready(silog_loss(pred, target))
    ref = jax.block_until_ready(silog_loss_ref(pred, target))
    assert jnp.allclose(loss, ref, rtol=1e-4, atol=1e-6), (loss, ref)

    # bf16 inputs + a size that is not a multiple of 128 (sub-128 pad path
    # and the half-precision streaming path).
    pred_b = jax.random.uniform(kp2, (3, 5, 7), jnp.float32,
                                minval=0.1, maxval=10.0).astype(jnp.bfloat16)
    target_b = jax.random.uniform(kt2, (3, 5, 7), jnp.float32,
                                  minval=0.1, maxval=10.0).astype(jnp.bfloat16)
    loss_b = jax.block_until_ready(silog_loss(pred_b, target_b))
    ref_b = jax.block_until_ready(silog_loss_ref(pred_b, target_b))
    assert jnp.allclose(loss_b, ref_b, rtol=1e-3, atol=1e-5), (loss_b, ref_b)

    # Multi-block ragged path: a small block size forces grid_rows=3 with a
    # partial last block, a 2-chunk split and a fully-masked clamped block.
    pred_c = jax.random.uniform(kp3, (2, 4, 32, 36), jnp.float32,
                                minval=0.1, maxval=10.0)
    target_c = jax.random.uniform(kt3, (2, 4, 32, 36), jnp.float32,
                                  minval=0.1, maxval=10.0)
    loss_c = jax.block_until_ready(silog_loss(pred_c, target_c, block_bytes=16 * 1024))
    ref_c = jax.block_until_ready(silog_loss_ref(pred_c, target_c))
    assert jnp.allclose(loss_c, ref_c, rtol=1e-4, atol=1e-6), (loss_c, ref_c)

    print("KERNEL_OK")
</pallas_src>

<mosaic_0001>
module attributes {stable_mosaic.version = 11 : i64} {
  func.func @_silog_partial_kernel(%arg0: i32, %arg1: i32, %arg2: memref<16x128xf32, #tpu.memory_space<vmem>>, %arg3: memref<16x128xf32, #tpu.memory_space<vmem>>, %arg4: memref<1x2x8x128xf32, #tpu.memory_space<vmem>>) attributes {dimension_semantics = [#tpu.dimension_semantics<parallel>, #tpu.dimension_semantics<arbitrary>], iteration_bounds = array<i64: 1, 1>, scalar_prefetch = 0 : i64, scratch_operands = 0 : i64, tpu.core_type = #tpu.core_type<tc>, window_params = [{transform_indices = @transform_0, window_bounds = array<i64: 16, 128>}, {transform_indices = @transform_1, window_bounds = array<i64: 16, 128>}, {transform_indices = @transform_2, window_bounds = array<i64: 1, 2, 8, 128>}]} {
    %c0_i32 = arith.constant 0 : i32
    %0 = arith.cmpi eq, %arg1, %c0_i32 : i32
    %1 = arith.extui %0 : i1 to i32
    %c0_i32_0 = arith.constant 0 : i32
    %2 = arith.cmpi ne, %1, %c0_i32_0 : i32
    scf.if %2 {
      %cst_24 = arith.constant 0.000000e+00 : f32
      %37 = vector.broadcast %cst_24 : f32 to vector<1x2x8x128xf32>
      %c0_25 = arith.constant 0 : index
      %c0_26 = arith.constant 0 : index
      %c0_27 = arith.constant 0 : index
      %c0_28 = arith.constant 0 : index
      %38 = vector.load %arg4[%c0_25, %c0_26, %c0_27, %c0_28] : memref<1x2x8x128xf32, #tpu.memory_space<vmem>>, vector<1x2x8x128xf32>
      tpu.vector_store %arg4[%c0_25, %c0_26, %c0_27, %c0_28], %37 {strides = array<i32>} : memref<1x2x8x128xf32, #tpu.memory_space<vmem>>, vector<1x2x8x128xf32>,
    } else {
    }
    %c0 = arith.constant 0 : index
    %c0_1 = arith.constant 0 : index
    %3 = vector.load %arg2[%c0, %c0_1] : memref<16x128xf32, #tpu.memory_space<vmem>>, vector<16x128xf32>
    %c0_2 = arith.constant 0 : index
    %c0_3 = arith.constant 0 : index
    %4 = vector.load %arg3[%c0_2, %c0_3] : memref<16x128xf32, #tpu.memory_space<vmem>>, vector<16x128xf32>
    %cst = arith.constant 9.99999997E-7 : f32
    %5 = vector.broadcast %cst : f32 to vector<16x128xf32>
    %6 = arith.addf %4, %5 : vector<16x128xf32>
    %cst_4 = arith.constant 9.99999997E-7 : f32
    %7 = vector.broadcast %cst_4 : f32 to vector<16x128xf32>
    %8 = arith.addf %3, %7 : vector<16x128xf32>
    %9 = arith.divf %6, %8 : vector<16x128xf32>
    %10 = math.log %9 : vector<16x128xf32>
    %c1_i32 = arith.constant 1 : i32
    %11 = arith.muli %arg0, %c1_i32 : i32
    %12 = arith.addi %11, %arg1 : i32
    %c16_i32 = arith.constant 16 : i32
    %13 = arith.muli %12, %c16_i32 : i32
    %14 = tpu.iota {dimensions = array<i32: 0>} : vector<16x128xi32>
    %15 = vector.broadcast %13 : i32 to vector<16x128xi32>
    %16 = arith.addi %15, %14 : vector<16x128xi32>
    %c16_i32_5 = arith.constant 16 : i32
    %17 = vector.broadcast %c16_i32_5 : i32 to vector<16x128xi32>
    %18 = arith.cmpi slt, %16, %17 : vector<16x128xi32>
    %cst_6 = arith.constant 0.000000e+00 : f32
    %19 = vector.broadcast %cst_6 : f32 to vector<16x128xf32>
    %20 = arith.select %18, %10, %19 : vector<16x128xi1>, vector<16x128xf32>
    %21 = vector.shape_cast %20 : vector<16x128xf32> to vector<2x8x128xf32>
    %c0_7 = arith.constant 0 : index
    %c0_8 = arith.constant 0 : index
    %c0_9 = arith.constant 0 : index
    %c0_10 = arith.constant 0 : index
    %22 = vector.load %arg4[%c0_7, %c0_8, %c0_9, %c0_10] : memref<1x2x8x128xf32, #tpu.memory_space<vmem>>, vector<1x1x8x128xf32>
    %23 = vector.shape_cast %22 : vector<1x1x8x128xf32> to vector<8x128xf32>
    %cst_11 = arith.constant dense<0.000000e+00> : vector<8x128xf32>
    %24 = vector.multi_reduction <add>, %21, %cst_11 [0] : vector<2x8x128xf32> to vector<8x128xf32>
    %25 = arith.addf %23, %24 : vector<8x128xf32>
    %c0_12 = arith.constant 0 : index
    %c0_13 = arith.constant 0 : index
    %c0_14 = arith.constant 0 : index
    %c0_15 = arith.constant 0 : index
    %26 = vector.load %arg4[%c0_12, %c0_13, %c0_14, %c0_15] : memref<1x2x8x128xf32, #tpu.memory_space<vmem>>, vector<1x1x8x128xf32>
    %27 = vector.shape_cast %26 : vector<1x1x8x128xf32> to vector<8x128xf32>
    %28 = vector.shape_cast %25 : vector<8x128xf32> to vector<1x1x8x128xf32>
    tpu.vector_store %arg4[%c0_12, %c0_13, %c0_14, %c0_15], %28 {strides = array<i32>} : memref<1x2x8x128xf32, #tpu.memory_space<vmem>>, vector<1x1x8x128xf32>,
    %c0_16 = arith.constant 0 : index
    %c1 = arith.constant 1 : index
    %c0_17 = arith.constant 0 : index
    %c0_18 = arith.constant 0 : index
    %29 = vector.load %arg4[%c0_16, %c1, %c0_17, %c0_18] : memref<1x2x8x128xf32, #tpu.memory_space<vmem>>, vector<1x1x8x128xf32>
    %30 = vector.shape_cast %29 : vector<1x1x8x128xf32> to vector<8x128xf32>
    %31 = arith.mulf %21, %21 : vector<2x8x128xf32>
    %cst_19 = arith.constant dense<0.000000e+00> : vector<8x128xf32>
    %32 = vector.multi_reduction <add>, %31, %cst_19 [0] : vector<2x8x128xf32> to vector<8x128xf32>
    %33 = arith.addf %30, %32 : vector<8x128xf32>
    %c0_20 = arith.constant 0 : index
    %c1_21 = arith.constant 1 : index
    %c0_22 = arith.constant 0 : index
    %c0_23 = arith.constant 0 : index
    %34 = vector.load %arg4[%c0_20, %c1_21, %c0_22, %c0_23] : memref<1x2x8x128xf32, #tpu.memory_space<vmem>>, vector<1x1x8x128xf32>
    %35 = vector.shape_cast %34 : vector<1x1x8x128xf32> to vector<8x128xf32>
    %36 = vector.shape_cast %33 : vector<8x128xf32> to vector<1x1x8x128xf32>
    tpu.vector_store %arg4[%c0_20, %c1_21, %c0_22, %c0_23], %36 {strides = array<i32>} : memref<1x2x8x128xf32, #tpu.memory_space<vmem>>, vector<1x1x8x128xf32>,
    return
  }
  func.func @transform_0(%arg0: i32, %arg1: i32) -> (i32, i32) {
    %c1_i32 = arith.constant 1 : i32
    %0 = arith.muli %arg0, %c1_i32 : i32
    %1 = arith.addi %0, %arg1 : i32
    %c0_i32 = arith.constant 0 : i32
    %2 = arith.minsi %1, %c0_i32 : i32
    %c0_i32_0 = arith.constant 0 : i32
    %c0_i32_1 = arith.constant 0 : i32
    return %2, %c0_i32_0 : i32, i32
  }
  func.func @transform_1(%arg0: i32, %arg1: i32) -> (i32, i32) {
    %c1_i32 = arith.constant 1 : i32
    %0 = arith.muli %arg0, %c1_i32 : i32
    %1 = arith.addi %0, %arg1 : i32
    %c0_i32 = arith.constant 0 : i32
    %2 = arith.minsi %1, %c0_i32 : i32
    %c0_i32_0 = arith.constant 0 : i32
    %c0_i32_1 = arith.constant 0 : i32
    return %2, %c0_i32_0 : i32, i32
  }
  func.func @transform_2(%arg0: i32, %arg1: i32) -> (i32, i32, i32, i32) {
    %c0_i32 = arith.constant 0 : i32
    %c0_i32_0 = arith.constant 0 : i32
    %c0_i32_1 = arith.constant 0 : i32
    %c0_i32_2 = arith.constant 0 : i32
    return %arg0, %c0_i32, %c0_i32_0, %c0_i32_1 : i32, i32, i32, i32
  }
}

</mosaic_0001>

<bundles_post_ra>
// kernel: tpu_custom_call.1
= control target key start
LH: loop header
LB: loop body
LE: loop exit
PB: predicated region body
PF: predicated region fallthrough
CT: control target
= control target key end

     0   :  { %7 = vsyncpa [#allocation3], 0  ;;  %s278_s0 = inlined_call_operand.hbm [shape: f32[16,128], index: 0, kind: input, shape index: {}]   ;;  %s279_s1 = inlined_call_operand.hbm [shape: f32[16,128], index: 1, kind: input, shape index: {}]   ;;  %s280_s2 = inlined_call_operand.hbm [shape: f32[1,2,8,128], index: 2, kind: output, shape index: {}]  }
   0x1   :  { %8 = vsyncpa [#allocation6], 0 }
   0x2   :  { %9 = vsyncpa [#allocation4], 0  ;;  %s213_s9 = smov [#allocation2]   ;;  %s141_s13 = scalar_lea.hbm %s278_s0, 256 }
   0x3   :  { %s21_s10 = sshll.u32 %s213_s9, 4  ;;  %p142_p0 = scmp.ne.s32.totalorder %s278_s0, %s141_s13  ;;  %s22_s10 = int_to_ptr.vmem [resolvable:$true] %s21_s10 }
   0x4   :  { %p145_p1 = scmp.lt.u32.totalorder %s141_s13, %s278_s0 }
   0x6   :  { %p147_p2 = pnand %p145_p1, %p142_p0 }
   0x8   :  { %150 = shalt.err (!%p147_p2)
}
   0x9   :  { %s151_s18 = scalar_lea.vmem %s22_s10, 256  ;;  %p156_p4 = scmp.lt.s32.totalorder %s22_s10, %s22_s10 }
   0xa   :  { %p152_p3 = scmp.ne.s32.totalorder %s22_s10, %s151_s18  ;;  %p157_p5 = scmp.lt.s32.totalorder %s151_s18, %s151_s18 }
   0xc   :  { %p158_p6 = por %p157_p5, %p156_p4 }
   0xe   :  { %p159_p7 = pnand %p158_p6, %p152_p3 }
  0x10   :  { %162 = shalt.err (!%p159_p7)
}
  0x11   :  { %s214_s19 = smov 128   ;;  %s215_s20 = smov 8  }
  0x12   :  { %27 = dma.hbm_to_vmem [thread:$0]  %s278_s0, 256, %s22_s10, [#allocation3], %s214_s19, %s214_s19, %s215_s20  }
  0x13   :  { %s216_s23 = smov [#allocation5]   ;;  %s163_s27 = scalar_lea.hbm %s279_s1, 256 }
  0x14   :  { %s39_s24 = sshll.u32 %s216_s23, 4  ;;  %p164_p8 = scmp.ne.s32.totalorder %s279_s1, %s163_s27  ;;  %s40_s24 = int_to_ptr.vmem [resolvable:$true] %s39_s24 }
  0x15   :  { %p167_p9 = scmp.lt.u32.totalorder %s163_s27, %s279_s1 }
  0x17   :  { %p169_p10 = pnand %p167_p9, %p164_p8 }
  0x19   :  { %172 = shalt.err (!%p169_p10)
}
  0x1a   :  { %s173_s4 = scalar_lea.vmem %s40_s24, 256  ;;  %p178_p12 = scmp.lt.s32.totalorder %s40_s24, %s40_s24 }
  0x1b   :  { %p174_p11 = scmp.ne.s32.totalorder %s40_s24, %s173_s4  ;;  %p179_p13 = scmp.lt.s32.totalorder %s173_s4, %s173_s4 }
  0x1d   :  { %p180_p0 = por %p179_p13, %p178_p12 }
  0x1f   :  { %p181_p1 = pnand %p180_p0, %p174_p11 }
  0x21   :  { %184 = shalt.err (!%p181_p1)
}
  0x22   :  { %45 = dma.hbm_to_vmem [thread:$0]  %s279_s1, 256, %s40_s24, [#allocation6], %s214_s19, %s214_s19, %s215_s20  }
  0x23   :  { %207 = dma.done.wait [#allocation3], 256  }
  0x24   :  { %208 = vsyncadd [#allocation3], 4294967040 }
  0x25   :  { %209 = dma.done.wait [#allocation6], 256  }
  0x26   :  { %210 = vsyncadd [#allocation6], 4294967040  ;;  %v66_v0 = vld [vmem:[#allocation2] sm:$0xff]  ;;  %v67_v1 = vld [vmem:[#allocation2 + $0x8] sm:$0xff]  ;;  %s217_s1 = smov [#allocation7]  }
  0x27   :  { %v72_v2 = vadd.f32 1e-06, %v66_v0  ;;  %v73_v3 = vadd.f32 1e-06, %v67_v1  ;;  %v68_v4 = vld [vmem:[#allocation5] sm:$0xff]  ;;  %v69_v5 = vld [vmem:[#allocation5 + $0x8] sm:$0xff] }
  0x28   :  { %v70_v6 = vadd.f32 1e-06, %v68_v4  ;;  %v71_v7 = vadd.f32 1e-06, %v69_v5  ;;  %s110_s6 = sshll.u32 %s217_s1, 4  ;;  %s111_s6 = int_to_ptr.vmem [resolvable:$true] %s110_s6 }
  0x29   :  { %133 = vrcp.f32 %v72_v2  ;;  %s185_s7 = scalar_lea.vmem %s111_s6, 256  ;;  %p190_p3 = scmp.lt.s32.totalorder %s111_s6, %s111_s6 }
  0x2a   :  { %135 = vrcp.f32 %v73_v3  ;;  %p186_p2 = scmp.ne.s32.totalorder %s111_s6, %s185_s7  ;;  %p191_p4 = scmp.lt.s32.totalorder %s185_s7, %s185_s7 }
  0x2c   :  { %p192_p5 = por %p191_p4, %p190_p3 }
  0x2e   :  { %p193_p6 = pnand %p192_p5, %p186_p2 }
  0x33   :  { %v134_v8 = vpop.eup %133 }
  0x34   :  { %v136_v9 = vpop.eup %135  ;;  %v75_v10 = vmul.f32 %v134_v8, %v70_v6 }
  0x35   :  { %v77_v11 = vmul.f32 %v136_v9, %v71_v7 }
  0x36   :  { %137 = vlog2.f32 %v75_v10 }
  0x37   :  { %139 = vlog2.f32 %v77_v11 }
  0x40   :  { %v138_v12 = vpop.eup %137 }
  0x41   :  { %v140_v13 = vpop.eup %139  ;;  %v79_v14 = vmul.f32 0.6931472, %v138_v12 }
  0x42   :  { %v81_v15 = vmul.f32 0.6931472, %v140_v13 }
  0x43   :  { %v100_v16 = vmul.f32 %v79_v14, %v79_v14 }
  0x44   :  { %v95_v17 = vadd.f32 %v81_v15, %v79_v14  ;;  %v101_v18 = vmul.f32 %v81_v15, %v81_v15 }
  0x46   :  { %v102_v19 = vadd.f32 %v101_v18, %v100_v16  ;;  %97 = vst [vmem:[#allocation7] sm:$0xff] %v95_v17 }
  0x48   :  { %104 = vst [vmem:[#allocation7 + $0x8] sm:$0xff] %v102_v19 }
  0x49   :  { %196 = shalt.err (!%p193_p6)
}
  0x4a   :  { %s197_s10 = scalar_lea.hbm %s280_s2, 256 }
  0x4b   :  { %p198_p7 = scmp.ne.s32.totalorder %s280_s2, %s197_s10  ;;  %p201_p8 = scmp.lt.u32.totalorder %s197_s10, %s280_s2 }
  0x4d   :  { %p203_p9 = pnand %p201_p8, %p198_p7 }
  0x4f   :  { %206 = shalt.err (!%p203_p9)
}
  0x50   :  { %116 = dma.vmem_to_hbm [thread:$0]  %s111_s6, 256, %s280_s2, [#allocation4], %s214_s19, %s214_s19, %s215_s20  }
  0x51   :  { %211 = dma.done.wait [#allocation4], 256  }
  0x52   :  { %212 = vsyncadd [#allocation4], 4294967040 }
  0x53   :  { %120 = vsyncpa [#allocation3], 1 }
  0x54   :  { %121 = vsyncpa [#allocation6], 1 }
  0x55   :  { %122 = vsyncpa [#allocation4], 1 }

</bundles_post_ra>
